<compile_context>
chip_gen: v5e
topology: v5e:2x2
jax: 0.10.0
libtpu: 0.0.40
codegen_flags: <defaults>
</compile_context>

<pallas_src>
import jax
import jax.numpy as jnp
from jax.experimental import pallas as pl
from jax.experimental.pallas import tpu as pltpu


def _round_up(n, m):
    return ((n + m - 1) // m) * m


def _linear_sigmoid_fused_kernel(x_ref, w_ref, b_ref, o_ref):
    """Single-block path: the whole (padded) problem lives in VMEM, no grid."""
    acc = jnp.dot(x_ref[...], w_ref[...], preferred_element_type=jnp.float32)
    acc = acc + b_ref[...]                      # bias broadcast over batch
    o_ref[...] = jax.nn.sigmoid(acc).astype(o_ref.dtype)


def _linear_sigmoid_tiled_kernel(x_ref, w_ref, b_ref, o_ref, acc_ref):
    """Tiled path: grid = (batch tiles, out tiles, K tiles); K is the reduction."""
    k = pl.program_id(2)

    @pl.when(k == 0)
    def _():
        # Fold the bias into the accumulator init instead of an epilogue add.
        acc_ref[...] = jnp.broadcast_to(
            b_ref[...].astype(jnp.float32), acc_ref.shape)

    acc_ref[...] += jnp.dot(x_ref[...], w_ref[...],
                            preferred_element_type=jnp.float32)

    @pl.when(k == pl.num_programs(2) - 1)
    def _():
        # sigmoid's exp runs on the EUP slot -> epilogue is effectively free.
        o_ref[...] = jax.nn.sigmoid(acc_ref[...]).astype(o_ref.dtype)


def simple_model_forward(x, w, b, *, tm_max=256, tn_max=256, tk_max=512):
    """sigmoid(x @ w.T + b).

    x: (B, In) f32; w: (Out, In) f32 (torch Linear layout); b: (Out,) f32.
    Returns (B, Out) f32.  Inputs are zero-padded to aligned shapes; padding
    is sliced off before returning.
    """
    B, In = x.shape
    Out, In_w = w.shape
    assert In == In_w and b.shape == (Out,)

    # Tile sizes: full (aligned) extent when small, capped when large.
    tm = tm_max if B > tm_max else _round_up(B, 8)
    tn = tn_max if Out > tn_max else _round_up(Out, 128)
    tk = tk_max if In > tk_max else _round_up(In, 128)

    Bp, Inp, Outp = _round_up(B, tm), _round_up(In, tk), _round_up(Out, tn)

    # Zero-pad: extra K rows/cols contribute nothing; extra batch/out rows and
    # columns are sliced off below, so the math is unchanged.
    xp = jnp.zeros((Bp, Inp), x.dtype).at[:B, :In].set(x)
    wtp = jnp.zeros((Inp, Outp), w.dtype).at[:In, :Out].set(w.T)
    bp = jnp.zeros((1, Outp), b.dtype).at[0, :Out].set(b)

    grid = (Bp // tm, Outp // tn, Inp // tk)

    if grid == (1, 1, 1):
        # Whole problem is one block: skip the grid entirely (no per-step
        # pipeline overhead for a kernel whose compute is a few hundred cycles).
        out = pl.pallas_call(
            _linear_sigmoid_fused_kernel,
            out_shape=jax.ShapeDtypeStruct((Bp, Outp), jnp.float32),
            in_specs=[
                pl.BlockSpec(memory_space=pltpu.MemorySpace.VMEM),
                pl.BlockSpec(memory_space=pltpu.MemorySpace.VMEM),
                pl.BlockSpec(memory_space=pltpu.MemorySpace.VMEM),
            ],
            out_specs=pl.BlockSpec(memory_space=pltpu.MemorySpace.VMEM),
        )(xp, wtp, bp)
    else:
        out = pl.pallas_call(
            _linear_sigmoid_tiled_kernel,
            out_shape=jax.ShapeDtypeStruct((Bp, Outp), jnp.float32),
            grid_spec=pltpu.PrefetchScalarGridSpec(
                num_scalar_prefetch=0,
                grid=grid,
                in_specs=[
                    pl.BlockSpec((tm, tk), lambda i, j, k: (i, k)),
                    pl.BlockSpec((tk, tn), lambda i, j, k: (k, j)),
                    pl.BlockSpec((1, tn), lambda i, j, k: (0, j)),
                ],
                out_specs=pl.BlockSpec((tm, tn), lambda i, j, k: (i, j)),
                scratch_shapes=[pltpu.VMEM((tm, tn), jnp.float32)],
            ),
            compiler_params=pltpu.CompilerParams(
                dimension_semantics=("parallel", "parallel", "arbitrary")),
        )(xp, wtp, bp)

    return out[:B, :Out]


if __name__ == "__main__":
    # --- Small shapes consistent with the module (TF-IDF features -> intents).
    batch, input_size, output_size = 4, 32, 8
    kx, kw, kb = jax.random.split(jax.random.PRNGKey(0), 3)
    bound = 1.0 / (input_size ** 0.5)
    x = jax.random.normal(kx, (batch, input_size), dtype=jnp.float32)
    w = jax.random.uniform(kw, (output_size, input_size), dtype=jnp.float32,
                           minval=-bound, maxval=bound)      # torch layout (Out, In)
    b = jax.random.uniform(kb, (output_size,), dtype=jnp.float32,
                           minval=-bound, maxval=bound)

    out = jax.block_until_ready(simple_model_forward(x, w, b))
    ref = jax.nn.sigmoid(x @ w.T + b)
    assert out.shape == ref.shape
    assert jnp.allclose(out, ref, atol=1e-5, rtol=1e-5), "fused-path mismatch"

    # --- Also exercise the tiled (gridded) path with forced small tiles.
    B2, In2, Out2 = 256, 384, 256
    kx2, kw2, kb2 = jax.random.split(jax.random.PRNGKey(1), 3)
    bound2 = 1.0 / (In2 ** 0.5)
    x2 = jax.random.normal(kx2, (B2, In2), dtype=jnp.float32)
    w2 = jax.random.uniform(kw2, (Out2, In2), dtype=jnp.float32,
                            minval=-bound2, maxval=bound2)
    b2 = jax.random.uniform(kb2, (Out2,), dtype=jnp.float32,
                            minval=-bound2, maxval=bound2)
    out2 = jax.block_until_ready(
        simple_model_forward(x2, w2, b2, tm_max=128, tn_max=128, tk_max=128))
    ref2 = jax.nn.sigmoid(x2 @ w2.T + b2)
    # Looser tolerance: kernel and XLA reference may use different f32 matmul
    # accumulation strategies on the MXU.
    assert jnp.allclose(out2, ref2, atol=2e-3, rtol=2e-3), "tiled-path mismatch"

    print("KERNEL_OK")
</pallas_src>

<mosaic_0001>
module attributes {stable_mosaic.version = 11 : i64} {
  func.func @_linear_sigmoid_fused_kernel(%arg0: memref<8x128xf32, #tpu.memory_space<vmem>>, %arg1: memref<128x128xf32, #tpu.memory_space<vmem>>, %arg2: memref<1x128xf32, #tpu.memory_space<vmem>>, %arg3: memref<8x128xf32, #tpu.memory_space<vmem>>) attributes {dimension_semantics = [], scalar_prefetch = 0 : i64, scratch_operands = 0 : i64, tpu.core_type = #tpu.core_type<tc>} {
    %c0 = arith.constant 0 : index
    %c0_0 = arith.constant 0 : index
    %0 = vector.load %arg0[%c0, %c0_0] : memref<8x128xf32, #tpu.memory_space<vmem>>, vector<8x128xf32>
    %c0_1 = arith.constant 0 : index
    %c0_2 = arith.constant 0 : index
    %1 = vector.load %arg1[%c0_1, %c0_2] : memref<128x128xf32, #tpu.memory_space<vmem>>, vector<128x128xf32>
    %cst = arith.constant dense<0.000000e+00> : vector<8x128xf32>
    %2 = tpu.matmul %0, %1, %cst {dimension_numbers = #tpu.dot_dimension_numbers<[1], [0], [0], [1], [0, 0, 1, 1], [], []>} : vector<8x128xf32>, vector<128x128xf32>, vector<8x128xf32> -> vector<8x128xf32>
    %c0_3 = arith.constant 0 : index
    %c0_4 = arith.constant 0 : index
    %3 = vector.load %arg2[%c0_3, %c0_4] : memref<1x128xf32, #tpu.memory_space<vmem>>, vector<1x128xf32>
    %4 = vector.broadcast %3 : vector<1x128xf32> to vector<8x128xf32>
    %5 = arith.addf %2, %4 : vector<8x128xf32>
    %6 = arith.negf %5 : vector<8x128xf32>
    %7 = math.exp %6 : vector<8x128xf32>
    %cst_5 = arith.constant 1.000000e+00 : f32
    %8 = vector.broadcast %cst_5 : f32 to vector<8x128xf32>
    %9 = arith.addf %8, %7 : vector<8x128xf32>
    %10 = arith.divf %8, %9 : vector<8x128xf32>
    %c0_6 = arith.constant 0 : index
    %c0_7 = arith.constant 0 : index
    %11 = vector.load %arg3[%c0_6, %c0_7] : memref<8x128xf32, #tpu.memory_space<vmem>>, vector<8x128xf32>
    tpu.vector_store %arg3[%c0_6, %c0_7], %10 {strides = array<i32>} : memref<8x128xf32, #tpu.memory_space<vmem>>, vector<8x128xf32>,
    return
  }
}

</mosaic_0001>

<bundles_post_ra>
// kernel: tpu_custom_call.1
= control target key start
LH: loop header
LB: loop body
LE: loop exit
PB: predicated region body
PF: predicated region fallthrough
CT: control target
= control target key end

     0   :  { %8 = vsyncpa [#allocation3], 0  ;;  %s250_s0 = inlined_call_operand.hbm [shape: f32[8,128], index: 0, kind: input, shape index: {}]   ;;  %s251_s1 = inlined_call_operand.hbm [shape: f32[128,128], index: 1, kind: input, shape index: {}]   ;;  %s252_s2 = inlined_call_operand.vmem [shape: f32[1,128], index: 2, kind: input, shape index: {}]   ;;  %s253_s3 = inlined_call_operand.hbm [shape: f32[8,128], index: 3, kind: output, shape index: {}]  }
   0x1   :  { %9 = vsyncpa [#allocation6], 0 }
   0x2   :  { %10 = vsyncpa [#allocation4], 0  ;;  %s16_s14 = sshll.u32 %s250_s0, 4  ;;  %s213_s15 = smov [#allocation2]   ;;  %s17_s14 = int_to_ptr.hbm [resolvable:$true] %s16_s14 }
   0x3   :  { %s18_s16 = sshll.u32 %s213_s15, 4  ;;  %s26_s19 = sshll.u32 %s251_s1, 4  ;;  %s19_s16 = int_to_ptr.vmem [resolvable:$true] %s18_s16  ;;  %s27_s19 = int_to_ptr.hbm [resolvable:$true] %s26_s19 }
   0x4   :  { %21 = dma.hbm_to_vmem [thread:$0]  %s17_s14, 128, %s19_s16, [#allocation3]  }
   0x5   :  { %s214_s20 = smov [#allocation5]   ;;  %s215_s22 = smov 128  }
   0x6   :  { %s28_s21 = sshll.u32 %s214_s20, 4  ;;  %s216_s23 = smov 8   ;;  %s29_s21 = int_to_ptr.vmem [resolvable:$true] %s28_s21 }
   0x7   :  { %34 = dma.hbm_to_vmem [thread:$0]  %s27_s19, 2048, %s29_s21, [#allocation6], %s215_s22, %s215_s22, %s216_s23  }
   0x8   :  { %207 = dma.done.wait [#allocation3], 128  }
   0x9   :  { %208 = vsyncadd [#allocation3], 4294967168 }
   0xa   :  { %209 = dma.done.wait [#allocation6], 2048  }
   0xb   :  { %210 = vsyncadd [#allocation6], 4294965248  ;;  %v61_v0 = vld [vmem:[#allocation5 + $0x78] sm:$0xff]  ;;  %v60_v1 = vld [vmem:[#allocation5 + $0x70] sm:$0xff]  ;;  %s217_s24 = smov [#allocation7]  }
   0xc   :  { %66 = vmatpush.msra.mxu0 %v61_v0  ;;  %v59_v2 = vld [vmem:[#allocation5 + $0x68] sm:$0xff]  ;;  %v58_v3 = vld [vmem:[#allocation5 + $0x60] sm:$0xff]  ;;  %v57_v4 = vld [vmem:[#allocation5 + $0x58] sm:$0xff]  ;;  %s111_s25 = sshll.u32 %s217_s24, 4  ;;  %s112_s25 = int_to_ptr.vmem [resolvable:$true] %s111_s25 }
   0xd   :  { %v56_v5 = vld [vmem:[#allocation5 + $0x50] sm:$0xff]  ;;  %v55_v6 = vld [vmem:[#allocation5 + $0x48] sm:$0xff]  ;;  %v54_v7 = vld [vmem:[#allocation5 + $0x40] sm:$0xff] }
   0xe   :  { %67 = vmatpush.msra.mxu0 %v60_v1  ;;  %v53_v8 = vld [vmem:[#allocation5 + $0x38] sm:$0xff]  ;;  %v52_v9 = vld [vmem:[#allocation5 + $0x30] sm:$0xff]  ;;  %v51_v10 = vld [vmem:[#allocation5 + $0x28] sm:$0xff] }
   0xf   :  { %v50_v11 = vld [vmem:[#allocation5 + $0x20] sm:$0xff]  ;;  %v49_v12 = vld [vmem:[#allocation5 + $0x18] sm:$0xff]  ;;  %v48_v13 = vld [vmem:[#allocation5 + $0x10] sm:$0xff] }
  0x10   :  { %68 = vmatpush.msra.mxu0 %v59_v2  ;;  %v47_v14 = vld [vmem:[#allocation5 + $0x8] sm:$0xff]  ;;  %v46_v15 = vld [vmem:[#allocation5] sm:$0xff]  ;;  %v45_v16 = vld [vmem:[#allocation2] sm:$0xff] }
  0x11   :  { %v130_v17 = vld [vmem:[%s252_s2] ss:$0 sm:$0xff]  ;;  %s113_s2 = sshll.u32 %s253_s3, 4  ;;  %s114_s2 = int_to_ptr.hbm [resolvable:$true] %s113_s2 }
  0x12   :  { %69 = vmatpush.msra.mxu0 %v58_v3 }
  0x14   :  { %70 = vmatpush.msra.mxu0 %v57_v4 }
  0x16   :  { %71 = vmatpush.msra.mxu0 %v56_v5 }
  0x18   :  { %72 = vmatpush.msra.mxu0 %v55_v6 }
  0x1a   :  { %73 = vmatpush.msra.mxu0 %v54_v7 }
  0x1c   :  { %74 = vmatpush.msra.mxu0 %v53_v8 }
  0x1e   :  { %75 = vmatpush.msra.mxu0 %v52_v9 }
  0x20   :  { %76 = vmatpush.msra.mxu0 %v51_v10 }
  0x22   :  { %77 = vmatpush.msra.mxu0 %v50_v11 }
  0x24   :  { %78 = vmatpush.msra.mxu0 %v49_v12 }
  0x26   :  { %79 = vmatpush.msra.mxu0 %v48_v13 }
  0x28   :  { %80 = vmatpush.msra.mxu0 %v47_v14 }
  0x2a   :  { %81 = vmatpush.msra.mxu0 %v46_v15 }
  0x2b   :  { %82 = vmatmul.f32.vlgmr.msra.gmra.mxu0 %v45_v16 }
  0xa8   :  { %v83_v18 = vpop.f32.mrf.mxu0 }
  0xa9   :  { %v84_v19 = vadd.f32 %v130_v17, %v83_v18 }
  0xab   :  { %v124_v20 = vmul.f32 -1.442695, %v84_v19 }
  0xad   :  { %131 = vpow2.f32 %v124_v20 }
  0xb3   :  { %v132_v21 = vpop.eup %131 }
  0xb4   :  { %v89_v22 = vadd.f32 1.0, %v132_v21 }
  0xb6   :  { %133 = vrcp.f32 %v89_v22  ;;  %v101_v26 = vand.u32 2147483648, %v89_v22  ;;  %v99_v28 = vand.u32 2147483647, %v89_v22  ;;  %vm95_vm1 = vweird.f32 %v89_v22 }
  0xb8   :  { %v102_v30 = vor.u32 1.1754944e-38, %v101_v26  ;;  %vm100_vm3 = vcmp.eq.f32.partialorder %v99_v28, 8.507059e+37 }
  0xbc   :  { %v134_v23 = vpop.eup %133 }
  0xbd   :  { %v91_v24 = vmul.f32 %v134_v23, %v89_v22  ;;  %vm96_vm0 = vweird.f32 %v134_v23 }
  0xbe   :  { %vm97_vm2 = vmor %vm95_vm1, %vm96_vm0 }
  0xbf   :  { %v92_v25 = vsub.f32 1.0, %v91_v24 }
  0xc1   :  { %v93_v27 = vmul.f32 %v134_v23, %v92_v25 }
  0xc3   :  { %v94_v29 = vadd.f32 %v134_v23, %v93_v27 }
  0xc5   :  { %v98_v31 = vsel %vm97_vm2, %v134_v23, %v94_v29 }
  0xc6   :  { %v103_v32 = vsel %vm100_vm3, %v102_v30, %v98_v31 }
  0xc7   :  { %105 = vst [vmem:[#allocation7] sm:$0xff] %v103_v32 }
  0xc8   :  { %116 = dma.vmem_to_hbm [thread:$0]  %s112_s25, 128, %s114_s2, [#allocation4]  }
  0xc9   :  { %211 = dma.done.wait [#allocation4], 128  }
  0xca   :  { %212 = vsyncadd [#allocation4], 4294967168 }
  0xcb   :  { %121 = vsyncpa [#allocation3], 1 }
  0xcc   :  { %122 = vsyncpa [#allocation6], 1 }
  0xcd   :  { %123 = vsyncpa [#allocation4], 1 }

</bundles_post_ra>
